<compile_context>
chip_gen: v7x
topology: tpu7x:2x2x1
jax: 0.10.0
libtpu: 0.0.40
codegen_flags: <defaults>
</compile_context>

<pallas_src>
import jax
import jax.numpy as jnp
from jax import lax
from jax.experimental import pallas as pl
from jax.experimental.pallas import tpu as pltpu


def classifier_kernel(ids_ref, mask_ref, emb_ref, w1_ref, b1_ref, w2_ref,
                      b2_ref, out_ref):
    # ids_ref : VMEM (B*S, 1) int32   token ids (flattened)
    # mask_ref: VMEM (B*S, 1) f32     mask (flattened, applied after ReLU)
    # emb_ref : VMEM (V, E)   f32     embedding table
    # w1_ref  : VMEM (E, H)   f32     linear1 weight (already transposed)
    # b1_ref  : VMEM (1, H)   f32     linear1 bias
    # w2_ref  : VMEM (H, O)   f32     linear2 weight (already transposed)
    # b2_ref  : VMEM (1, O)   f32     linear2 bias
    # out_ref : VMEM (B, O)   f32
    BS = ids_ref.shape[0]
    V, _E = emb_ref.shape
    H = w1_ref.shape[1]
    B, _O = out_ref.shape
    S = BS // B

    # --- Embedding gather as a one-hot MXU matmul (V is small). ---
    # A single (B*S, V) @ (V, E) push replaces B*S serialized scalar-indexed
    # row copies; gather is exact (each one-hot row selects one element) and
    # an out-of-range id produces an all-zero embedding (no OOB VMEM read).
    ids = ids_ref[...]                                           # (BS, 1) i32
    col = lax.broadcasted_iota(jnp.int32, (BS, V), 1)            # (BS, V)
    one_hot = (col == ids).astype(jnp.float32)                   # (BS, V)
    x = jnp.dot(one_hot, emb_ref[...],
                preferred_element_type=jnp.float32)              # (BS, E)

    # --- Linear1 + ReLU + mask (mask applied after ReLU, as in torch). ---
    h = jnp.dot(x, w1_ref[...],
                preferred_element_type=jnp.float32) + b1_ref[...]  # (BS, H)
    h = jnp.maximum(h, 0.0) * mask_ref[...]                        # (BS, H)

    # --- Max-pool over the sequence dimension. ---
    pooled = jnp.max(h.reshape(B, S, H), axis=1)                 # (B, H)

    # --- Linear2: single dot + bias (no packed-weight re-slicing). ---
    out_ref[...] = (jnp.dot(pooled, w2_ref[...],
                            preferred_element_type=jnp.float32)
                    + b2_ref[...]).astype(out_ref.dtype)


def classifier_forward(ids, mask, emb, w1, b1, w2, b2):
    B, S = ids.shape
    V, E = emb.shape
    H = w1.shape[1]
    O = w2.shape[1]
    del V, E, H  # all shapes flow through the kernel refs

    ids_flat = ids.reshape(B * S, 1).astype(jnp.int32)           # (B*S, 1)
    mask_flat = mask.reshape(B * S, 1).astype(jnp.float32)       # (B*S, 1)

    vmem = pl.BlockSpec(memory_space=pltpu.MemorySpace.VMEM)
    # TODO(synk): when scaling V / B*S up, switch emb to memory_space=pl.ANY
    # with a PrefetchScalarGridSpec DMA gather, bf16 table storage, and a
    # "parallel" batch grid axis for v7x's two TensorCores.
    return pl.pallas_call(
        classifier_kernel,
        out_shape=jax.ShapeDtypeStruct((B, O), jnp.float32),
        in_specs=[vmem] * 7,     # ids, mask, emb, w1, b1, w2, b2
        out_specs=vmem,
    )(ids_flat, mask_flat, emb, w1, b1, w2, b2)


def reference_forward(ids, mask, emb, w1, b1, w2, b2):
    x = emb[ids]                                   # (B, S, E)
    h = x @ w1 + b1                                # (B, S, H)
    h = jnp.maximum(h, 0.0) * mask[:, :, None]
    pooled = jnp.max(h, axis=1)                    # (B, H)
    return pooled @ w2 + b2                        # (B, O)


if __name__ == "__main__":
    # Small shapes consistent with the module (torch's reshape forces H == E).
    B, S = 2, 8
    V, E, H, O = 64, 32, 32, 4

    key = jax.random.PRNGKey(0)
    k_ids, k_mask, k_emb, k_w1, k_b1, k_w2, k_b2 = jax.random.split(key, 7)

    ids = jax.random.randint(k_ids, (B, S), 0, V, dtype=jnp.int32)
    mask = (jax.random.uniform(k_mask, (B, S)) > 0.25).astype(jnp.float32)

    # torch Linear is y = x @ W.T + b; we store the already-transposed form.
    emb = jax.random.normal(k_emb, (V, E), jnp.float32) * 0.1
    w1 = jax.random.normal(k_w1, (E, H), jnp.float32) * 0.1
    b1 = jax.random.normal(k_b1, (1, H), jnp.float32) * 0.1
    w2 = jax.random.normal(k_w2, (H, O), jnp.float32) * 0.1
    b2 = jax.random.normal(k_b2, (1, O), jnp.float32) * 0.1

    out = classifier_forward(ids, mask, emb, w1, b1, w2, b2)
    out = jax.block_until_ready(out)

    ref = reference_forward(ids, mask, emb, w1, b1, w2, b2)
    assert out.shape == (B, O)
    # Tolerance covers MXU vs XLA matmul accumulation-order differences only
    # (the one-hot gather itself is exact).
    assert jnp.allclose(out, ref, atol=1e-4, rtol=1e-4), (out, ref)
    print("KERNEL_OK")
</pallas_src>

<mosaic_0001>
module attributes {stable_mosaic.version = 11 : i64} {
  func.func @classifier_kernel(%arg0: memref<16x1xi32, #tpu.memory_space<vmem>>, %arg1: memref<16x1xf32, #tpu.memory_space<vmem>>, %arg2: memref<64x32xf32, #tpu.memory_space<vmem>>, %arg3: memref<32x32xf32, #tpu.memory_space<vmem>>, %arg4: memref<1x32xf32, #tpu.memory_space<vmem>>, %arg5: memref<32x4xf32, #tpu.memory_space<vmem>>, %arg6: memref<1x4xf32, #tpu.memory_space<vmem>>, %arg7: memref<2x4xf32, #tpu.memory_space<vmem>>) attributes {dimension_semantics = [], scalar_prefetch = 0 : i64, scratch_operands = 0 : i64, tpu.core_type = #tpu.core_type<tc>} {
    %c0 = arith.constant 0 : index
    %c0_0 = arith.constant 0 : index
    %0 = vector.load %arg0[%c0, %c0_0] : memref<16x1xi32, #tpu.memory_space<vmem>>, vector<16x1xi32>
    %1 = tpu.iota {dimensions = array<i32: 1>} : vector<16x64xi32>
    %2 = vector.broadcast %0 : vector<16x1xi32> to vector<16x64xi32>
    %3 = arith.cmpi eq, %1, %2 : vector<16x64xi32>
    %4 = arith.extui %3 : vector<16x64xi1> to vector<16x64xi32>
    %5 = arith.sitofp %4 : vector<16x64xi32> to vector<16x64xf32>
    %c0_1 = arith.constant 0 : index
    %c0_2 = arith.constant 0 : index
    %6 = vector.load %arg2[%c0_1, %c0_2] : memref<64x32xf32, #tpu.memory_space<vmem>>, vector<64x32xf32>
    %cst = arith.constant dense<0.000000e+00> : vector<16x32xf32>
    %7 = tpu.matmul %5, %6, %cst {dimension_numbers = #tpu.dot_dimension_numbers<[1], [0], [0], [1], [0, 0, 1, 1], [], []>} : vector<16x64xf32>, vector<64x32xf32>, vector<16x32xf32> -> vector<16x32xf32>
    %c0_3 = arith.constant 0 : index
    %c0_4 = arith.constant 0 : index
    %8 = vector.load %arg3[%c0_3, %c0_4] : memref<32x32xf32, #tpu.memory_space<vmem>>, vector<32x32xf32>
    %cst_5 = arith.constant dense<0.000000e+00> : vector<16x32xf32>
    %9 = tpu.matmul %7, %8, %cst_5 {dimension_numbers = #tpu.dot_dimension_numbers<[1], [0], [0], [1], [0, 0, 1, 1], [], []>} : vector<16x32xf32>, vector<32x32xf32>, vector<16x32xf32> -> vector<16x32xf32>
    %c0_6 = arith.constant 0 : index
    %c0_7 = arith.constant 0 : index
    %10 = vector.load %arg4[%c0_6, %c0_7] : memref<1x32xf32, #tpu.memory_space<vmem>>, vector<1x32xf32>
    %11 = vector.broadcast %10 : vector<1x32xf32> to vector<16x32xf32>
    %12 = arith.addf %9, %11 : vector<16x32xf32>
    %cst_8 = arith.constant 0.000000e+00 : f32
    %13 = vector.broadcast %cst_8 : f32 to vector<16x32xf32>
    %14 = arith.maximumf %12, %13 : vector<16x32xf32>
    %c0_9 = arith.constant 0 : index
    %c0_10 = arith.constant 0 : index
    %15 = vector.load %arg1[%c0_9, %c0_10] : memref<16x1xf32, #tpu.memory_space<vmem>>, vector<16x1xf32>
    %16 = vector.broadcast %15 : vector<16x1xf32> to vector<16x32xf32>
    %17 = arith.mulf %14, %16 : vector<16x32xf32>
    %18 = vector.shape_cast %17 : vector<16x32xf32> to vector<2x8x32xf32>
    %cst_11 = arith.constant dense<0xFF800000> : vector<2x32xf32>
    %19 = vector.multi_reduction <maximumf>, %18, %cst_11 [1] : vector<2x8x32xf32> to vector<2x32xf32>
    %c0_12 = arith.constant 0 : index
    %c0_13 = arith.constant 0 : index
    %20 = vector.load %arg5[%c0_12, %c0_13] : memref<32x4xf32, #tpu.memory_space<vmem>>, vector<32x4xf32>
    %cst_14 = arith.constant dense<0.000000e+00> : vector<2x4xf32>
    %21 = tpu.matmul %19, %20, %cst_14 {dimension_numbers = #tpu.dot_dimension_numbers<[1], [0], [0], [1], [0, 0, 1, 1], [], []>} : vector<2x32xf32>, vector<32x4xf32>, vector<2x4xf32> -> vector<2x4xf32>
    %c0_15 = arith.constant 0 : index
    %c0_16 = arith.constant 0 : index
    %22 = vector.load %arg6[%c0_15, %c0_16] : memref<1x4xf32, #tpu.memory_space<vmem>>, vector<1x4xf32>
    %23 = vector.broadcast %22 : vector<1x4xf32> to vector<2x4xf32>
    %24 = arith.addf %21, %23 : vector<2x4xf32>
    %c0_17 = arith.constant 0 : index
    %c0_18 = arith.constant 0 : index
    %25 = vector.load %arg7[%c0_17, %c0_18] : memref<2x4xf32, #tpu.memory_space<vmem>>, vector<2x4xf32>
    tpu.vector_store %arg7[%c0_17, %c0_18], %24 {strides = array<i32>} : memref<2x4xf32, #tpu.memory_space<vmem>>, vector<2x4xf32>,
    return
  }
}

</mosaic_0001>

<bundles_post_ra>
// kernel: tpu_custom_call.1
= control target key start
LH: loop header
LB: loop body
LE: loop exit
PB: predicated region body
PF: predicated region fallthrough
CT: control target
= control target key end

     0   :  { %v491_v2 = vmov 0   ;;  %s619_s0 = inlined_call_operand.vmem [shape: s32[16,1], index: 0, kind: input, shape index: {}]   ;;  %s620_s1 = inlined_call_operand.vmem [shape: f32[16,1], index: 1, kind: input, shape index: {}]   ;;  %s621_s2 = inlined_call_operand.vmem [shape: f32[64,32], index: 2, kind: input, shape index: {}]   ;;  %s622_s3 = inlined_call_operand.vmem [shape: f32[32,32], index: 3, kind: input, shape index: {}]   ;;  %s623_s4 = inlined_call_operand.vmem [shape: f32[1,32], index: 4, kind: input, shape index: {}]   ;;  %s624_s5 = inlined_call_operand.vmem [shape: f32[32,4], index: 5, kind: input, shape index: {}]   ;;  %s625_s6 = inlined_call_operand.vmem [shape: f32[1,4], index: 6, kind: input, shape index: {}]   ;;  %s626_s7 = inlined_call_operand.hbm [shape: f32[2,4], index: 7, kind: output, shape index: {}]  }
   0x1   :  { %v27_v0 = vld [vmem:[%s619_s0] sm:$0xff]  ;;  %465 = vset.pattern.permute.xlu0 %v491_v2  ;;  %v44_v3 = vld [vmem:[%s621_s2 + $0x8] sm:$0xff]  ;;  %v45_v4 = vld [vmem:[%s621_s2 + $0x10] sm:$0xff]  ;;  %466 = vset.pattern.permute.xlu1 %v491_v2 }
   0x2   :  { %v43_v1 = vld [vmem:[%s621_s2] sm:$0xff]  ;;  %v46_v5 = vld [vmem:[%s621_s2 + $0x18] sm:$0xff]  ;;  %32 = vperm.xlu0 %465, %v27_v0   ;;  %v28_v6 = vld [vmem:[%s619_s0 + $0x8] sm:$0xff] }
   0x3   :  { %v430_v7 = vpack.c.bf16 %v44_v3, %v43_v1  ;;  %v434_v8 = vpack.c.bf16 %v46_v5, %v45_v4  ;;  %v47_v9 = vld [vmem:[%s621_s2 + $0x20] sm:$0xff]  ;;  %v48_v10 = vld [vmem:[%s621_s2 + $0x28] sm:$0xff] }
   0x4   :  { %12 = vsyncpa [#allocation3], 0  ;;  %v438_v11 = vpack.c.bf16 %v48_v10, %v47_v9  ;;  %v49_v12 = vld [vmem:[%s621_s2 + $0x30] sm:$0xff]  ;;  %v50_v13 = vld [vmem:[%s621_s2 + $0x38] sm:$0xff]  ;;  %v29_v21 = vlaneseq  ;;  %vm51_vm0 = vcmask 523264   ;;  %v492_v24 = vmov 0.0  }
   0x5   :  { %431 = vmatprep.subr.bf16.mxu0 %v430_v7  ;;  %v133_v14 = vld [vmem:[%s622_s3] sm:$0xff]  ;;  %v134_v15 = vld [vmem:[%s622_s3 + $0x8] sm:$0xff]  ;;  %v135_v16 = vld [vmem:[%s622_s3 + $0x10] sm:$0xff]  ;;  %v442_v19 = vpack.c.bf16 %v50_v13, %v49_v12  ;;  %vm144_vm3 = vcmask 261120   ;;  %v493_v35 = vmov 0.0|0.0   ;;  %vm494_vm4 = vmmov 0  }
   0x6   :  { %433 = vmatpush3.bf16.msra.mxu0 %v430_v7  ;;  %35 = vperm.xlu0 %465, %v28_v6   ;;  %v446_v17 = vpack.c.bf16 %v134_v15, %v133_v14  ;;  %v136_v18 = vld [vmem:[%s622_s3 + $0x18] sm:$0xff]  ;;  %v30_v22 = vand.u32 127, %v29_v21  ;;  %v228_v28 = vld [vmem:[%s620_s1] sm:$0xff]  ;;  %v229_v29 = vld [vmem:[%s620_s1 + $0x8] sm:$0xff]  ;;  %vm269_vm5 = vcmask 1041409   ;;  %s495_s16 = smov [#allocation2]  }
   0x7   :  { %435 = vmatprep.subr.bf16.mxu0 %v434_v8  ;;  %v450_v20 = vpack.c.bf16 %v136_v18, %v135_v16  ;;  %232 = vperm.xlu1 %466, %v228_v28   ;;  %v256_v32 = vld [vmem:[%s624_s5] sm:$0xff]  ;;  %v257_v33 = vld [vmem:[%s624_s5 + $0x8] sm:$0xff]  ;;  %v258_v36 = vld [vmem:[%s624_s5 + $0x10] sm:$0xff]  ;;  %s351_s17 = sshll.u32 %s495_s16, 4  ;;  %vm343_vm6 = vcmask 25600   ;;  %s352_s17 = int_to_ptr.vmem [resolvable:$true] %s351_s17 }
   0x8   :  { %447 = vmatprep.subr.bf16.mxu1 %v446_v17  ;;  %v455_v34 = vpack.c.bf16 %v257_v33, %v256_v32  ;;  %v259_v37 = vld [vmem:[%s624_s5 + $0x18] sm:$0xff]  ;;  %v363_v40 = vld [vmem:[%s623_s4] ss:$0 sm:$0xff]  ;;  %s467_s18 = scalar_lea.vmem %s352_s17, 32  ;;  %p472_p1 = scmp.lt.s32.totalorder %s352_s17, %s352_s17 }
   0x9   :  { %449 = vmatpush3.bf16.msra.mxu1 %v446_v17  ;;  %v458_v38 = vpack.c.bf16 %v259_v37, %v258_v36  ;;  %v366_v1 = vld [vmem:[%s625_s6] ss:$0 sm:$0xff]  ;;  %p468_p0 = scmp.ne.s32.totalorder %s352_s17, %s467_s18  ;;  %p473_p2 = scmp.lt.s32.totalorder %s467_s18, %s467_s18 }
   0xa   :  { %437 = vmatpush3.bf16.msra.mxu0 %v434_v8  ;;  %451 = vmatprep.subr.bf16.mxu1 %v450_v20 }
   0xb   :  { %439 = vmatprep.subr.bf16.mxu0 %v438_v11  ;;  %237 = vperm.xlu1 %466, %v229_v29   ;;  %p474_p3 = por %p473_p2, %p472_p1 }
   0xd   :  { %453 = vmatpush3.bf16.msra.mxu1 %v450_v20  ;;  %p475_p4 = pnand %p474_p3, %p468_p0 }
   0xe   :  { %441 = vmatpush3.bf16.msra.mxu0 %v438_v11  ;;  %454 = vmatprep.subr.bf16.mxu1 %v493_v35 }
   0xf   :  { %443 = vmatprep.subr.bf16.mxu0 %v442_v19 }
  0x12   :  { %445 = vmatpush3.bf16.msra.mxu0 %v442_v19 }
  0x81   :  { %v33_v23 = vpop.permute.xlu0 %32 }
  0x82   :  { %vm37_vm1 = vcmp.eq.s32.totalorder %v30_v22, %v33_v23 }
  0x83   :  { %v359_v25 = vsel %vm37_vm1, 1.0, %v492_v24 }
  0x84   :  { %405 = vmatprep.mubr.msk.f32.mxu0 %vm51_vm0, %v359_v25 }
  0x85   :  { %v36_v26 = vpop.permute.xlu0 %35 }
  0x86   :  { %vm38_vm2 = vcmp.eq.s32.totalorder %v30_v22, %v36_v26  ;;  %v233_v39 = vpop.permute.xlu1 %232 }
  0x87   :  { %v360_v27 = vsel %vm38_vm2, 1.0, %v492_v24 }
  0x88   :  { %406 = vmatmul.mubr.msk.f32.vlgmr.msra.gmra.mrb[0].mxu0 %vm51_vm0, %v360_v27 }
  0x8a   :  { %v238_v46 = vpop.permute.xlu1 %237 }
 0x15b   :  { %v407_v30 = vpop.f32.mrb[0].mxu0 }
 0x15c   :  { %v124_v31 = vpop.f32.mrb[1].mxu0 }
 0x15d   :  { %416 = vmatprep.mubr.msk.f32.mxu1 %vm144_vm3, %v124_v31 }
 0x15e   :  { %417 = vmatmul.mubr.msk.f32.vlgmr.msra.gmra.mrb[0].mxu1 %vm144_vm3, %v407_v30 }
 0x15f   :  { %456 = vmatpush3.bf16.msra.mxu1 %v455_v34  ;;  %427 = vmatprep.mubr.msk.f32.mxu1 %vm494_vm4, %v492_v24 }
 0x160   :  { %457 = vmatprep.subr.bf16.mxu1 %v493_v35 }
 0x163   :  { %459 = vmatpush3.bf16.msra.mxu1 %v458_v38 }
 0x231   :  { %v418_v41 = vpop.f32.mrb[0].mxu1 }
 0x232   :  { %v223_v42 = vadd.f32 %v418_v41, %v363_v40  ;;  %v217_v43 = vpop.f32.mrb[1].mxu1 }
 0x233   :  { %v218_v44 = vadd.f32 %v363_v40, %v217_v43 }
 0x234   :  { %v227_v45 = vmax.f32 %v223_v42, 0.0 }
 0x235   :  { %v226_v47 = vmax.f32 %v218_v44, 0.0 }
 0x236   :  { %v241_v48 = vmul.f32 %v238_v46, %v227_v45 }
 0x237   :  { %v240_v49 = vmul.f32 %v233_v39, %v226_v47 }
 0x238   :  { %v249_v50 = vsel %vm144_vm3, %v241_v48, -inf }
 0x239   :  { %v250_v51 = vrot.slane %v249_v50, 4  ;;  %v242_v52 = vsel %vm144_vm3, %v240_v49, -inf }
 0x23a   :  { %v243_v53 = vrot.slane %v242_v52, 4 }
 0x23b   :  { %v251_v54 = vmax.f32 %v249_v50, %v250_v51 }
 0x23c   :  { %v244_v55 = vmax.f32 %v242_v52, %v243_v53 }
 0x23d   :  { %v252_v56 = vrot.slane %v251_v54, 2 }
 0x23e   :  { %v245_v57 = vrot.slane %v244_v55, 2 }
 0x23f   :  { %v253_v58 = vmax.f32 %v251_v54, %v252_v56 }
 0x240   :  { %v246_v59 = vmax.f32 %v244_v55, %v245_v57 }
 0x241   :  { %v254_v60 = vrot.slane %v253_v58, 1 }
 0x242   :  { %v247_v61 = vrot.slane %v246_v59, 1 }
 0x243   :  { %v255_v62 = vmax.f32 %v253_v58, %v254_v60 }
 0x244   :  { %v248_v63 = vmax.f32 %v246_v59, %v247_v61 }
 0x246   :  { %v270_v0 = vsel %vm269_vm5, %v255_v62, %v248_v63 }
 0x247   :  { %428 = vmatmul.mubr.msk.f32.vlgmr.msra.gmra.mrb[2].mxu1 %vm144_vm3, %v270_v0 }
 0x31a   :  { %v339_v2 = vpop.f32.mrb[2].mxu1 }
 0x31b   :  { %v340_v3 = vadd.f32 %v366_v1, %v339_v2  ;;  %v429_v4 = vpop.f32.mrb[3].mxu1 }
 0x31d   :  { %344 = vst.msk [vmem:[#allocation2] sm:$0x3] %vm343_vm6, %v340_v3 }
 0x31e   :  { %478 = shalt.err (!%p475_p4)
}
 0x31f   :  { %s479_s20 = scalar_lea.hbm %s626_s7, 32 }
 0x320   :  { %p480_p5 = scmp.ne.s32.totalorder %s626_s7, %s479_s20  ;;  %p483_p6 = scmp.lt.u32.totalorder %s479_s20, %s626_s7 }
 0x322   :  { %p485_p7 = pnand %p483_p6, %p480_p5 }
 0x324   :  { %488 = shalt.err (!%p485_p7)
}
 0x325   :  { %354 = dma.vmem_to_hbm [thread:$0]  %s352_s17, 32, %s626_s7, [#allocation3]  }
 0x326   :  { %489 = dma.done.wait [#allocation3], 32  }
 0x327   :  { %490 = vsyncadd [#allocation3], 4294967264 }
 0x328   :  { %358 = vsyncpa [#allocation3], 1 }

</bundles_post_ra>
